<compile_context>
chip_gen: v6e
topology: v6e:2x2x1
jax: 0.10.0
libtpu: 0.0.40
codegen_flags: <defaults>
</compile_context>

<pallas_src>
import functools
import math
from typing import List, Optional

import jax
import jax.numpy as jnp
from jax.experimental import pallas as pl
from jax.experimental.pallas import tpu as pltpu

_LANE = 128      # lane width (last dim) alignment for padded weight dims
_SUBLANE = 8     # sublane (second-to-last dim) alignment for batch tiles


def _round_up(v: int, m: int) -> int:
    return (v + m - 1) // m * m


def _nbytes(shape, dtype) -> int:
    return math.prod(shape) * jnp.dtype(dtype).itemsize


def _vmem_capacity_bytes() -> int:
    """Physical VMEM per TensorCore; conservative v7x value if undetectable."""
    try:
        cap = getattr(pltpu.get_tpu_info(), "vmem_capacity_bytes", None)
        if cap:
            return int(cap)
    except Exception:
        pass
    return 64 << 20   # v7x physical VMEM (smallest of the three generations)


# ---------------------------------------------------------------------------
# Fused MLP kernel: x -> [Linear + ReLU]*(L-1) -> Linear, all in VMEM/vregs.
# refs = (x_ref, w0_ref, b0_ref, w1_ref, b1_ref, ..., o_ref)
# ---------------------------------------------------------------------------
def _mlp_kernel(*refs, num_layers: int):
    x_ref = refs[0]
    o_ref = refs[-1]
    h = x_ref[...]
    for l in range(num_layers):
        w = refs[1 + 2 * l][...]
        b = refs[2 + 2 * l][...]                 # (1, N) f32 bias
        # Cast activations to the weight dtype (bf16 MXU fast path on all gens);
        # MXU accumulates in f32 via preferred_element_type.
        h = jnp.dot(h.astype(w.dtype), w, preferred_element_type=jnp.float32)
        h = h + b                                # f32 epilogue
        if l < num_layers - 1:
            h = jnp.maximum(h, 0.0)              # ReLU; Dropout == identity (eval)
    o_ref[...] = h.astype(o_ref.dtype)


# ---------------------------------------------------------------------------
# Wrapper: weights padded/resident, x streamed unpadded, batch axis tiled.
# ---------------------------------------------------------------------------
def fused_mlp_forward(params, x: jax.Array, *, weights_in_bf16: bool = True) -> jax.Array:
    """params: list of (w [In, Out], b [1, Out]); x: [B, In] -> [B, Out_final]."""
    B, in_features = x.shape
    num_layers = len(params)
    dims = [in_features] + [w.shape[1] for (w, _) in params]
    # Layer-0 K dim stays unpadded (x streams as-is); all other dims pad to 128.
    dims_p = [dims[0]] + [_round_up(d, _LANE) for d in dims[1:]]

    w_dtype = jnp.bfloat16 if weights_in_bf16 else params[0][0].dtype

    # ---- pad + cast weights (one-time, tiny); biases kept f32 ----------------
    flat_wb = []
    weight_bytes = 0
    for l, (w, b) in enumerate(params):
        di, do = w.shape
        w_p = jnp.zeros((dims_p[l], dims_p[l + 1]), w_dtype).at[:di, :do].set(
            w.astype(w_dtype))
        b_p = jnp.zeros((1, dims_p[l + 1]), jnp.float32).at[:, :do].set(
            b.reshape(1, do).astype(jnp.float32))
        flat_wb += [w_p, b_p]
        weight_bytes += _nbytes(w_p.shape, w_dtype) + _nbytes(b_p.shape, jnp.float32)

    # ---- generation-aware VMEM budgets ---------------------------------------
    vmem_cap = _vmem_capacity_bytes()
    resident_budget = int(0.45 * vmem_cap)       # ~28 MiB on v7x, ~57 MiB on v5e/v6e
    if weight_bytes > resident_budget:
        # TODO(synk): fall back to a K/N-tiled reduction grid instead of raising.
        raise NotImplementedError(
            f"padded weights ({weight_bytes} B) exceed the resident-VMEM budget "
            f"({resident_budget} B); K/N-tiled fallback not implemented")

    max_w = max(dims_p[1:])
    out_dtype = x.dtype

    def act_bytes(bt: int) -> int:
        io = 2 * _nbytes((bt, in_features), x.dtype)       # double-buffered x tile
        io += 2 * _nbytes((bt, dims_p[-1]), out_dtype)     # double-buffered out tile
        work = 4 * bt * max_w * 4                          # f32 in-flight activations
        return io + work

    # ---- batch tile: big for HBM roofline & MXU fill; grid >= 2 when possible -
    if B <= _SUBLANE:
        b_tile = B                                         # full-extent block (legal)
    else:
        b_tile = min(512,                                  # 256-512 target
                     _round_up(B, _SUBLANE),
                     _round_up(pl.cdiv(B, 2), _SUBLANE))   # keep >=2 steps (v7x 2 TCs)
    act_budget = int(0.60 * vmem_cap) - weight_bytes
    while b_tile > _SUBLANE and act_bytes(b_tile) > act_budget:
        b_tile = max(_SUBLANE, _round_up(b_tile // 2, _SUBLANE))
    grid = pl.cdiv(B, b_tile)

    def run(single_buffer_weights: bool) -> jax.Array:
        wb_kwargs = {}
        if single_buffer_weights and hasattr(pl, "Buffered"):
            # Grid-invariant blocks: double-buffering buys nothing, halve their VMEM.
            wb_kwargs = dict(pipeline_mode=pl.Buffered(1))

        # Activation tiles keep the default 2-deep pipeline; bump to pl.Buffered(3)
        # only if profiling shows the x-tile DMA still exposed at this tile size.
        in_specs = [pl.BlockSpec((b_tile, in_features), lambda i: (i, 0))]
        for l in range(num_layers):
            in_specs.append(
                pl.BlockSpec((dims_p[l], dims_p[l + 1]), lambda i: (0, 0), **wb_kwargs))
            in_specs.append(
                pl.BlockSpec((1, dims_p[l + 1]), lambda i: (0, 0), **wb_kwargs))
        out_specs = pl.BlockSpec((b_tile, dims_p[-1]), lambda i: (i, 0))

        wt_mult = 1 if single_buffer_weights else 2
        est = wt_mult * weight_bytes + act_bytes(b_tile) + (4 << 20)
        vmem_limit = int(min(0.75 * vmem_cap, max(32 << 20, est)))

        return pl.pallas_call(
            functools.partial(_mlp_kernel, num_layers=num_layers),
            out_shape=jax.ShapeDtypeStruct((B, dims_p[-1]), out_dtype),
            grid=(grid,),
            in_specs=in_specs,
            out_specs=out_specs,
            compiler_params=pltpu.CompilerParams(
                dimension_semantics=("parallel",),
                vmem_limit_bytes=vmem_limit),
        )(x, *flat_wb)

    try:
        out_p = run(single_buffer_weights=True)
    except Exception:
        # Fallback for Pallas builds that reject single-buffered pipeline_mode.
        out_p = run(single_buffer_weights=False)

    return out_p[:, :dims[-1]]


# ---------------------------------------------------------------------------
# Parameter construction mirroring nn.Linear's U(-1/sqrt(fan_in), 1/sqrt(fan_in)).
# Weights stored as [in, out] (transposed from PyTorch); biases kept f32.
# ---------------------------------------------------------------------------
def init_linear_model_params(key: jax.Array,
                             input_size: int,
                             output_size: int,
                             hidden_layers: Optional[List[int]] = None):
    sizes = [input_size] + (list(hidden_layers) if hidden_layers else []) + [output_size]
    params = []
    for fan_in, fan_out in zip(sizes[:-1], sizes[1:]):
        key, kw, kb = jax.random.split(key, 3)
        bound = 1.0 / math.sqrt(fan_in)
        w = jax.random.uniform(kw, (fan_in, fan_out), jnp.float32, -bound, bound)
        b = jax.random.uniform(kb, (1, fan_out), jnp.float32, -bound, bound)
        params.append((w, b))
    return params


def _reference_forward(params, x, *, weights_in_bf16: bool) -> jax.Array:
    """Pure-JAX reference matching the kernel's dtype handling."""
    h = x.astype(jnp.float32)
    n = len(params)
    for l, (w, b) in enumerate(params):
        wd = w.astype(jnp.bfloat16) if weights_in_bf16 else w
        h = jnp.dot(h.astype(wd.dtype), wd, preferred_element_type=jnp.float32)
        h = h + b.reshape(1, -1).astype(jnp.float32)
        if l < n - 1:
            h = jnp.maximum(h, 0.0)
    return h


# ---------------------------------------------------------------------------
# Demo / smoke test
# ---------------------------------------------------------------------------
if __name__ == "__main__":
    input_size = 16
    output_size = 8
    hidden_layers = [32, 32]

    key = jax.random.PRNGKey(0)
    k_params, k_x1, k_x2 = jax.random.split(key, 3)
    params = init_linear_model_params(k_params, input_size, output_size, hidden_layers)

    # --- Case 1: tiny batch, bit-faithful f32 weight path ----------------------
    x1 = jax.random.normal(k_x1, (4, input_size), jnp.float32)
    out1 = jax.block_until_ready(fused_mlp_forward(params, x1, weights_in_bf16=False))
    ref1 = _reference_forward(params, x1, weights_in_bf16=False)
    assert out1.shape == (4, output_size)
    assert jnp.allclose(out1, ref1, atol=1e-4, rtol=1e-4)

    # --- Case 2: batch=20 -> 2 grid steps + ragged edge block; default bf16 path
    x2 = jax.random.normal(k_x2, (20, input_size), jnp.float32)
    out2 = jax.block_until_ready(fused_mlp_forward(params, x2))   # bf16 weights default
    ref2 = _reference_forward(params, x2, weights_in_bf16=True)
    assert out2.shape == (20, output_size)
    assert jnp.allclose(out2, ref2, atol=2e-2, rtol=2e-2)

    print("KERNEL_OK")
</pallas_src>

<mosaic_0001>
module attributes {stable_mosaic.version = 11 : i64} {
  func.func @_mlp_kernel(%arg0: i32, %arg1: memref<4x16xf32, #tpu.memory_space<vmem>>, %arg2: memref<16x128xf32, #tpu.memory_space<vmem>>, %arg3: memref<1x128xf32, #tpu.memory_space<vmem>>, %arg4: memref<128x128xf32, #tpu.memory_space<vmem>>, %arg5: memref<1x128xf32, #tpu.memory_space<vmem>>, %arg6: memref<128x128xf32, #tpu.memory_space<vmem>>, %arg7: memref<1x128xf32, #tpu.memory_space<vmem>>, %arg8: memref<4x128xf32, #tpu.memory_space<vmem>>) attributes {dimension_semantics = [#tpu.dimension_semantics<parallel>], iteration_bounds = array<i64: 1>, scalar_prefetch = 0 : i64, scratch_operands = 0 : i64, tpu.core_type = #tpu.core_type<tc>, window_params = [{transform_indices = @transform_0, window_bounds = array<i64: 4, 16>}, {pipeline_mode = #tpu.pipeline_mode<synchronous>, transform_indices = @transform_1, window_bounds = array<i64: 16, 128>}, {pipeline_mode = #tpu.pipeline_mode<synchronous>, transform_indices = @transform_2, window_bounds = array<i64: 1, 128>}, {pipeline_mode = #tpu.pipeline_mode<synchronous>, transform_indices = @transform_3, window_bounds = array<i64: 128, 128>}, {pipeline_mode = #tpu.pipeline_mode<synchronous>, transform_indices = @transform_4, window_bounds = array<i64: 1, 128>}, {pipeline_mode = #tpu.pipeline_mode<synchronous>, transform_indices = @transform_5, window_bounds = array<i64: 128, 128>}, {pipeline_mode = #tpu.pipeline_mode<synchronous>, transform_indices = @transform_6, window_bounds = array<i64: 1, 128>}, {transform_indices = @transform_7, window_bounds = array<i64: 4, 128>}]} {
    %c0 = arith.constant 0 : index
    %c0_0 = arith.constant 0 : index
    %0 = vector.load %arg1[%c0, %c0_0] : memref<4x16xf32, #tpu.memory_space<vmem>>, vector<4x16xf32>
    %c0_1 = arith.constant 0 : index
    %c0_2 = arith.constant 0 : index
    %1 = vector.load %arg2[%c0_1, %c0_2] : memref<16x128xf32, #tpu.memory_space<vmem>>, vector<16x128xf32>
    %c0_3 = arith.constant 0 : index
    %c0_4 = arith.constant 0 : index
    %2 = vector.load %arg3[%c0_3, %c0_4] : memref<1x128xf32, #tpu.memory_space<vmem>>, vector<1x128xf32>
    %cst = arith.constant dense<0.000000e+00> : vector<4x128xf32>
    %3 = tpu.matmul %0, %1, %cst {dimension_numbers = #tpu.dot_dimension_numbers<[1], [0], [0], [1], [0, 0, 1, 1], [], []>} : vector<4x16xf32>, vector<16x128xf32>, vector<4x128xf32> -> vector<4x128xf32>
    %4 = vector.broadcast %2 : vector<1x128xf32> to vector<4x128xf32>
    %5 = arith.addf %3, %4 : vector<4x128xf32>
    %cst_5 = arith.constant 0.000000e+00 : f32
    %6 = vector.broadcast %cst_5 : f32 to vector<4x128xf32>
    %7 = arith.maximumf %5, %6 : vector<4x128xf32>
    %c0_6 = arith.constant 0 : index
    %c0_7 = arith.constant 0 : index
    %8 = vector.load %arg4[%c0_6, %c0_7] : memref<128x128xf32, #tpu.memory_space<vmem>>, vector<128x128xf32>
    %c0_8 = arith.constant 0 : index
    %c0_9 = arith.constant 0 : index
    %9 = vector.load %arg5[%c0_8, %c0_9] : memref<1x128xf32, #tpu.memory_space<vmem>>, vector<1x128xf32>
    %cst_10 = arith.constant dense<0.000000e+00> : vector<4x128xf32>
    %10 = tpu.matmul %7, %8, %cst_10 {dimension_numbers = #tpu.dot_dimension_numbers<[1], [0], [0], [1], [0, 0, 1, 1], [], []>} : vector<4x128xf32>, vector<128x128xf32>, vector<4x128xf32> -> vector<4x128xf32>
    %11 = vector.broadcast %9 : vector<1x128xf32> to vector<4x128xf32>
    %12 = arith.addf %10, %11 : vector<4x128xf32>
    %cst_11 = arith.constant 0.000000e+00 : f32
    %13 = vector.broadcast %cst_11 : f32 to vector<4x128xf32>
    %14 = arith.maximumf %12, %13 : vector<4x128xf32>
    %c0_12 = arith.constant 0 : index
    %c0_13 = arith.constant 0 : index
    %15 = vector.load %arg6[%c0_12, %c0_13] : memref<128x128xf32, #tpu.memory_space<vmem>>, vector<128x128xf32>
    %c0_14 = arith.constant 0 : index
    %c0_15 = arith.constant 0 : index
    %16 = vector.load %arg7[%c0_14, %c0_15] : memref<1x128xf32, #tpu.memory_space<vmem>>, vector<1x128xf32>
    %cst_16 = arith.constant dense<0.000000e+00> : vector<4x128xf32>
    %17 = tpu.matmul %14, %15, %cst_16 {dimension_numbers = #tpu.dot_dimension_numbers<[1], [0], [0], [1], [0, 0, 1, 1], [], []>} : vector<4x128xf32>, vector<128x128xf32>, vector<4x128xf32> -> vector<4x128xf32>
    %18 = vector.broadcast %16 : vector<1x128xf32> to vector<4x128xf32>
    %19 = arith.addf %17, %18 : vector<4x128xf32>
    %c0_17 = arith.constant 0 : index
    %c0_18 = arith.constant 0 : index
    %20 = vector.load %arg8[%c0_17, %c0_18] : memref<4x128xf32, #tpu.memory_space<vmem>>, vector<4x128xf32>
    tpu.vector_store %arg8[%c0_17, %c0_18], %19 {strides = array<i32>} : memref<4x128xf32, #tpu.memory_space<vmem>>, vector<4x128xf32>,
    return
  }
  func.func @transform_0(%arg0: i32) -> (i32, i32) {
    %c0_i32 = arith.constant 0 : i32
    %c0_i32_0 = arith.constant 0 : i32
    return %arg0, %c0_i32 : i32, i32
  }
  func.func @transform_1(%arg0: i32) -> (i32, i32) {
    %c0_i32 = arith.constant 0 : i32
    %c0_i32_0 = arith.constant 0 : i32
    %c0_i32_1 = arith.constant 0 : i32
    return %c0_i32, %c0_i32_0 : i32, i32
  }
  func.func @transform_2(%arg0: i32) -> (i32, i32) {
    %c0_i32 = arith.constant 0 : i32
    %c0_i32_0 = arith.constant 0 : i32
    %c0_i32_1 = arith.constant 0 : i32
    return %c0_i32, %c0_i32_0 : i32, i32
  }
  func.func @transform_3(%arg0: i32) -> (i32, i32) {
    %c0_i32 = arith.constant 0 : i32
    %c0_i32_0 = arith.constant 0 : i32
    %c0_i32_1 = arith.constant 0 : i32
    return %c0_i32, %c0_i32_0 : i32, i32
  }
  func.func @transform_4(%arg0: i32) -> (i32, i32) {
    %c0_i32 = arith.constant 0 : i32
    %c0_i32_0 = arith.constant 0 : i32
    %c0_i32_1 = arith.constant 0 : i32
    return %c0_i32, %c0_i32_0 : i32, i32
  }
  func.func @transform_5(%arg0: i32) -> (i32, i32) {
    %c0_i32 = arith.constant 0 : i32
    %c0_i32_0 = arith.constant 0 : i32
    %c0_i32_1 = arith.constant 0 : i32
    return %c0_i32, %c0_i32_0 : i32, i32
  }
  func.func @transform_6(%arg0: i32) -> (i32, i32) {
    %c0_i32 = arith.constant 0 : i32
    %c0_i32_0 = arith.constant 0 : i32
    %c0_i32_1 = arith.constant 0 : i32
    return %c0_i32, %c0_i32_0 : i32, i32
  }
  func.func @transform_7(%arg0: i32) -> (i32, i32) {
    %c0_i32 = arith.constant 0 : i32
    %c0_i32_0 = arith.constant 0 : i32
    return %arg0, %c0_i32 : i32, i32
  }
}

module attributes {stable_mosaic.version = 11 : i64} {
  func.func @_mlp_kernel(%arg0: i32, %arg1: memref<4x16xf32, #tpu.memory_space<vmem>>, %arg2: memref<16x128xf32, #tpu.memory_space<vmem>>, %arg3: memref<1x128xf32, #tpu.memory_space<vmem>>, %arg4: memref<128x128xf32, #tpu.memory_space<vmem>>, %arg5: memref<1x128xf32, #tpu.memory_space<vmem>>, %arg6: memref<128x128xf32, #tpu.memory_space<vmem>>, %arg7: memref<1x128xf32, #tpu.memory_space<vmem>>, %arg8: memref<4x128xf32, #tpu.memory_space<vmem>>) attributes {dimension_semantics = [#tpu.dimension_semantics<parallel>], iteration_bounds = array<i64: 1>, scalar_prefetch = 0 : i64, scratch_operands = 0 : i64, tpu.core_type = #tpu.core_type<tc>, window_params = [{transform_indices = @transform_0, window_bounds = array<i64: 4, 16>}, {pipeline_mode = #tpu.pipeline_mode<synchronous>, transform_indices = @transform_1, window_bounds = array<i64: 16, 128>}, {pipeline_mode = #tpu.pipeline_mode<synchronous>, transform_indices = @transform_2, window_bounds = array<i64: 1, 128>}, {pipeline_mode = #tpu.pipeline_mode<synchronous>, transform_indices = @transform_3, window_bounds = array<i64: 128, 128>}, {pipeline_mode = #tpu.pipeline_mode<synchronous>, transform_indices = @transform_4, window_bounds = array<i64: 1, 128>}, {pipeline_mode = #tpu.pipeline_mode<synchronous>, transform_indices = @transform_5, window_bounds = array<i64: 128, 128>}, {pipeline_mode = #tpu.pipeline_mode<synchronous>, transform_indices = @transform_6, window_bounds = array<i64: 1, 128>}, {transform_indices = @transform_7, window_bounds = array<i64: 4, 128>}]} {
    %c0 = arith.constant 0 : index
    %c0_0 = arith.constant 0 : index
    %0 = vector.load %arg1[%c0, %c0_0] : memref<4x16xf32, #tpu.memory_space<vmem>>, vector<4x16xf32>
    %c0_1 = arith.constant 0 : index
    %c0_2 = arith.constant 0 : index
    %1 = vector.load %arg2[%c0_1, %c0_2] : memref<16x128xf32, #tpu.memory_space<vmem>>, vector<16x128xf32>
    %c0_3 = arith.constant 0 : index
    %c0_4 = arith.constant 0 : index
    %2 = vector.load %arg3[%c0_3, %c0_4] : memref<1x128xf32, #tpu.memory_space<vmem>>, vector<1x128xf32>
    %cst = arith.constant dense<0.000000e+00> : vector<4x128xf32>
    %3 = tpu.matmul %0, %1, %cst {dimension_numbers = #tpu.dot_dimension_numbers<[1], [0], [0], [1], [0, 0, 1, 1], [], []>} : vector<4x16xf32>, vector<16x128xf32>, vector<4x128xf32> -> vector<4x128xf32>
    %4 = vector.broadcast %2 : vector<1x128xf32> to vector<4x128xf32>
    %5 = arith.addf %3, %4 : vector<4x128xf32>
    %cst_5 = arith.constant 0.000000e+00 : f32
    %6 = vector.broadcast %cst_5 : f32 to vector<4x128xf32>
    %7 = arith.maximumf %5, %6 : vector<4x128xf32>
    %c0_6 = arith.constant 0 : index
    %c0_7 = arith.constant 0 : index
    %8 = vector.load %arg4[%c0_6, %c0_7] : memref<128x128xf32, #tpu.memory_space<vmem>>, vector<128x128xf32>
    %c0_8 = arith.constant 0 : index
    %c0_9 = arith.constant 0 : index
    %9 = vector.load %arg5[%c0_8, %c0_9] : memref<1x128xf32, #tpu.memory_space<vmem>>, vector<1x128xf32>
    %cst_10 = arith.constant dense<0.000000e+00> : vector<4x128xf32>
    %10 = tpu.matmul %7, %8, %cst_10 {dimension_numbers = #tpu.dot_dimension_numbers<[1], [0], [0], [1], [0, 0, 1, 1], [], []>} : vector<4x128xf32>, vector<128x128xf32>, vector<4x128xf32> -> vector<4x128xf32>
    %11 = vector.broadcast %9 : vector<1x128xf32> to vector<4x128xf32>
    %12 = arith.addf %10, %11 : vector<4x128xf32>
    %cst_11 = arith.constant 0.000000e+00 : f32
    %13 = vector.broadcast %cst_11 : f32 to vector<4x128xf32>
    %14 = arith.maximumf %12, %13 : vector<4x128xf32>
    %c0_12 = arith.constant 0 : index
    %c0_13 = arith.constant 0 : index
    %15 = vector.load %arg6[%c0_12, %c0_13] : memref<128x128xf32, #tpu.memory_space<vmem>>, vector<128x128xf32>
    %c0_14 = arith.constant 0 : index
    %c0_15 = arith.constant 0 : index
    %16 = vector.load %arg7[%c0_14, %c0_15] : memref<1x128xf32, #tpu.memory_space<vmem>>, vector<1x128xf32>
    %cst_16 = arith.constant dense<0.000000e+00> : vector<4x128xf32>
    %17 = tpu.matmul %14, %15, %cst_16 {dimension_numbers = #tpu.dot_dimension_numbers<[1], [0], [0], [1], [0, 0, 1, 1], [], []>} : vector<4x128xf32>, vector<128x128xf32>, vector<4x128xf32> -> vector<4x128xf32>
    %18 = vector.broadcast %16 : vector<1x128xf32> to vector<4x128xf32>
    %19 = arith.addf %17, %18 : vector<4x128xf32>
    %c0_17 = arith.constant 0 : index
    %c0_18 = arith.constant 0 : index
    %20 = vector.load %arg8[%c0_17, %c0_18] : memref<4x128xf32, #tpu.memory_space<vmem>>, vector<4x128xf32>
    tpu.vector_store %arg8[%c0_17, %c0_18], %19 {strides = array<i32>} : memref<4x128xf32, #tpu.memory_space<vmem>>, vector<4x128xf32>,
    return
  }
  func.func @transform_0(%arg0: i32) -> (i32, i32) {
    %c0_i32 = arith.constant 0 : i32
    %c0_i32_0 = arith.constant 0 : i32
    return %arg0, %c0_i32 : i32, i32
  }
  func.func @transform_1(%arg0: i32) -> (i32, i32) {
    %c0_i32 = arith.constant 0 : i32
    %c0_i32_0 = arith.constant 0 : i32
    %c0_i32_1 = arith.constant 0 : i32
    return %c0_i32, %c0_i32_0 : i32, i32
  }
  func.func @transform_2(%arg0: i32) -> (i32, i32) {
    %c0_i32 = arith.constant 0 : i32
    %c0_i32_0 = arith.constant 0 : i32
    %c0_i32_1 = arith.constant 0 : i32
    return %c0_i32, %c0_i32_0 : i32, i32
  }
  func.func @transform_3(%arg0: i32) -> (i32, i32) {
    %c0_i32 = arith.constant 0 : i32
    %c0_i32_0 = arith.constant 0 : i32
    %c0_i32_1 = arith.constant 0 : i32
    return %c0_i32, %c0_i32_0 : i32, i32
  }
  func.func @transform_4(%arg0: i32) -> (i32, i32) {
    %c0_i32 = arith.constant 0 : i32
    %c0_i32_0 = arith.constant 0 : i32
    %c0_i32_1 = arith.constant 0 : i32
    return %c0_i32, %c0_i32_0 : i32, i32
  }
  func.func @transform_5(%arg0: i32) -> (i32, i32) {
    %c0_i32 = arith.constant 0 : i32
    %c0_i32_0 = arith.constant 0 : i32
    %c0_i32_1 = arith.constant 0 : i32
    return %c0_i32, %c0_i32_0 : i32, i32
  }
  func.func @transform_6(%arg0: i32) -> (i32, i32) {
    %c0_i32 = arith.constant 0 : i32
    %c0_i32_0 = arith.constant 0 : i32
    %c0_i32_1 = arith.constant 0 : i32
    return %c0_i32, %c0_i32_0 : i32, i32
  }
  func.func @transform_7(%arg0: i32) -> (i32, i32) {
    %c0_i32 = arith.constant 0 : i32
    %c0_i32_0 = arith.constant 0 : i32
    return %arg0, %c0_i32 : i32, i32
  }
}

</mosaic_0001>

<bundles_post_ra>
// kernel: tpu_custom_call.1
= control target key start
LH: loop header
LB: loop body
LE: loop exit
PB: predicated region body
PF: predicated region fallthrough
CT: control target
= control target key end

     0   :  { %12 = vsyncpa [#allocation3], 0  ;;  %s727_s0 = inlined_call_operand.hbm [shape: f32[4,16], index: 0, kind: input, shape index: {}]   ;;  %s728_s1 = inlined_call_operand.hbm [shape: f32[16,128], index: 1, kind: input, shape index: {}]   ;;  %s729_s2 = inlined_call_operand.vmem [shape: f32[1,128], index: 2, kind: input, shape index: {}]   ;;  %s730_s3 = inlined_call_operand.hbm [shape: f32[128,128], index: 3, kind: input, shape index: {}]   ;;  %s731_s4 = inlined_call_operand.vmem [shape: f32[1,128], index: 4, kind: input, shape index: {}]   ;;  %s732_s5 = inlined_call_operand.hbm [shape: f32[128,128], index: 5, kind: input, shape index: {}]   ;;  %s733_s6 = inlined_call_operand.vmem [shape: f32[1,128], index: 6, kind: input, shape index: {}]   ;;  %s734_s7 = inlined_call_operand.hbm [shape: f32[4,128], index: 7, kind: output, shape index: {}]  }
   0x1   :  { %13 = vsyncpa [#allocation6], 0 }
   0x2   :  { %14 = vsyncpa [#allocation9], 0 }
   0x3   :  { %15 = vsyncpa [#allocation4], 0  ;;  %s605_s24 = smov [#allocation5]  }
   0x4   :  { %s31_s25 = sshll.u32 %s605_s24, 4  ;;  %s32_s25 = int_to_ptr.vmem [resolvable:$true] %s31_s25 }
   0x5   :  { %s505_s26 = scalar_lea.vmem %s32_s25, 256  ;;  %p510_p1 = scmp.lt.s32.totalorder %s32_s25, %s32_s25 }
   0x6   :  { %p506_p0 = scmp.ne.s32.totalorder %s32_s25, %s505_s26  ;;  %p511_p2 = scmp.lt.s32.totalorder %s505_s26, %s505_s26 }
   0x8   :  { %p512_p3 = por %p511_p2, %p510_p1 }
   0xa   :  { %p513_p4 = pnand %p512_p3, %p506_p0 }
   0xc   :  { %516 = shalt.err (!%p513_p4)
}
   0xd   :  { %s606_s27 = smov 128   ;;  %s607_s28 = smov 8  }
   0xe   :  { %37 = dma.hbm_to_vmem [thread:$0]  %s728_s1, 256, %s32_s25, [#allocation6], %s606_s27, %s606_s27, %s607_s28  }
   0xf   :  { %s608_s8 = smov [#allocation2]   ;;  %s609_s10 = smov [#allocation7]  }
  0x10   :  { %s22_s9 = sshll.u32 %s608_s8, 4  ;;  %s45_s11 = sshll.u32 %s609_s10, 4  ;;  %s23_s9 = int_to_ptr.vmem [resolvable:$true] %s22_s9  ;;  %s46_s11 = int_to_ptr.vmem [resolvable:$true] %s45_s11 }
  0x11   :  { %s525_s12 = scalar_lea.vmem %s23_s9, 64  ;;  %p530_p6 = scmp.lt.s32.totalorder %s23_s9, %s23_s9 }
  0x12   :  { %p526_p5 = scmp.ne.s32.totalorder %s23_s9, %s525_s12  ;;  %p531_p7 = scmp.lt.s32.totalorder %s525_s12, %s525_s12 }
  0x14   :  { %p532_p8 = por %p531_p7, %p530_p6 }
  0x16   :  { %p533_p9 = pnand %p532_p8, %p526_p5 }
  0x18   :  { %536 = shalt.err (!%p533_p9)
}
  0x19   :  { %25 = dma.hbm_to_vmem [thread:$0]  %s727_s0, 64, %s23_s9, [#allocation3]  }
  0x1a   :  { %s545_s15 = scalar_lea.vmem %s46_s11, 2048  ;;  %p550_p11 = scmp.lt.s32.totalorder %s46_s11, %s46_s11 }
  0x1b   :  { %p546_p10 = scmp.ne.s32.totalorder %s46_s11, %s545_s15  ;;  %p551_p12 = scmp.lt.s32.totalorder %s545_s15, %s545_s15 }
  0x1d   :  { %p552_p13 = por %p551_p12, %p550_p11 }
  0x1f   :  { %p553_p0 = pnand %p552_p13, %p546_p10 }
  0x21   :  { %556 = shalt.err (!%p553_p0)
}
  0x22   :  { %51 = dma.hbm_to_vmem [thread:$0]  %s730_s3, 2048, %s46_s11, [#allocation6], %s606_s27, %s606_s27, %s607_s28  }
  0x23   :  { %s610_s17 = smov [#allocation8]  }
  0x24   :  { %s59_s18 = sshll.u32 %s610_s17, 4  ;;  %s60_s18 = int_to_ptr.vmem [resolvable:$true] %s59_s18 }
  0x25   :  { %s565_s19 = scalar_lea.vmem %s60_s18, 2048  ;;  %p570_p2 = scmp.lt.s32.totalorder %s60_s18, %s60_s18 }
  0x26   :  { %p566_p1 = scmp.ne.s32.totalorder %s60_s18, %s565_s19  ;;  %p571_p3 = scmp.lt.s32.totalorder %s565_s19, %s565_s19 }
  0x28   :  { %p572_p4 = por %p571_p3, %p570_p2 }
  0x2a   :  { %p573_p5 = pnand %p572_p4, %p566_p1 }
  0x2c   :  { %576 = shalt.err (!%p573_p5)
}
  0x2d   :  { %65 = dma.hbm_to_vmem [thread:$0]  %s732_s5, 2048, %s60_s18, [#allocation9], %s606_s27, %s606_s27, %s607_s28  }
  0x2e   :  { %597 = dma.done.wait [#allocation3], 64  }
  0x2f   :  { %598 = vsyncadd [#allocation3], 4294967232 }
  0x30   :  { %599 = dma.done.wait [#allocation6], 2304  }
  0x31   :  { %600 = vsyncadd [#allocation6], 4294964992 }
  0x32   :  { %601 = dma.done.wait [#allocation9], 2048  }
  0x33   :  { %602 = vsyncadd [#allocation9], 4294965248  ;;  %v611_v0 = vmov 0.0   ;;  %vm612_vm0 = vmmov 0   ;;  %v82_v1 = vld [vmem:[#allocation5 + $0x8] sm:$0xff]  ;;  %v81_v2 = vld [vmem:[#allocation5] sm:$0xff] }
  0x34   :  { %411 = vmatprep.subr.mxu0 %v611_v0  ;;  %415 = vmatprep.mubr.msk.f32.mxu0 %vm612_vm0, %v611_v0  ;;  %v80_v3 = vld [vmem:[#allocation2] sm:$0xf]  ;;  %vm90_vm1 = vcmask 130048   ;;  %v180_v4 = vld [vmem:[#allocation7 + $0x78] sm:$0xff]  ;;  %v179_v5 = vld [vmem:[#allocation7 + $0x70] sm:$0xff]  ;;  %s613_s24 = smov [#allocation10]  }
  0x35   :  { %418 = vmatprep.subr.mxu1 %v611_v0  ;;  %450 = vmatprep.mubr.msk.f32.mxu1 %vm612_vm0, %v611_v0  ;;  %v178_v6 = vld [vmem:[#allocation7 + $0x68] sm:$0xff]  ;;  %v177_v7 = vld [vmem:[#allocation7 + $0x60] sm:$0xff]  ;;  %v176_v8 = vld [vmem:[#allocation7 + $0x58] sm:$0xff]  ;;  %s359_s25 = sshll.u32 %s613_s24, 4  ;;  %s360_s25 = int_to_ptr.vmem [resolvable:$true] %s359_s25 }
  0x36   :  { %412 = vmatpush3.msra.mxu0 %v82_v1  ;;  %419 = vmatpush3.msra.mxu1 %v180_v4  ;;  %v175_v9 = vld [vmem:[#allocation7 + $0x50] sm:$0xff]  ;;  %v174_v10 = vld [vmem:[#allocation7 + $0x48] sm:$0xff]  ;;  %v173_v11 = vld [vmem:[#allocation7 + $0x40] sm:$0xff]  ;;  %s577_s26 = scalar_lea.vmem %s360_s25, 64  ;;  %p582_p7 = scmp.lt.s32.totalorder %s360_s25, %s360_s25 }
  0x37   :  { %413 = vmatprep.subr.mxu0 %v611_v0  ;;  %420 = vmatprep.subr.mxu1 %v611_v0  ;;  %v172_v12 = vld [vmem:[#allocation7 + $0x38] sm:$0xff]  ;;  %v171_v13 = vld [vmem:[#allocation7 + $0x30] sm:$0xff]  ;;  %v170_v14 = vld [vmem:[#allocation7 + $0x28] sm:$0xff]  ;;  %p578_p6 = scmp.ne.s32.totalorder %s360_s25, %s577_s26  ;;  %p583_p8 = scmp.lt.s32.totalorder %s577_s26, %s577_s26 }
  0x38   :  { %414 = vmatpush3.msra.mxu0 %v81_v2  ;;  %421 = vmatpush3.msra.mxu1 %v179_v5  ;;  %v169_v15 = vld [vmem:[#allocation7 + $0x20] sm:$0xff]  ;;  %v168_v16 = vld [vmem:[#allocation7 + $0x18] sm:$0xff]  ;;  %v167_v17 = vld [vmem:[#allocation7 + $0x10] sm:$0xff] }
  0x39   :  { %416 = vmatmul.mubr.msk.f32.vlgmr.msra.gmra.mxu0 %vm90_vm1, %v80_v3  ;;  %422 = vmatprep.subr.mxu1 %v611_v0  ;;  %v166_v18 = vld [vmem:[#allocation7 + $0x8] sm:$0xff]  ;;  %v165_v19 = vld [vmem:[#allocation7] sm:$0xff]  ;;  %v274_v20 = vld [vmem:[#allocation8 + $0x78] sm:$0xff]  ;;  %p584_p9 = por %p583_p8, %p582_p7 }
  0x3a   :  { %453 = vmatprep.subr.mxu0 %v611_v0  ;;  %423 = vmatpush3.msra.mxu1 %v178_v6  ;;  %v273_v21 = vld [vmem:[#allocation8 + $0x70] sm:$0xff]  ;;  %v272_v22 = vld [vmem:[#allocation8 + $0x68] sm:$0xff]  ;;  %v271_v23 = vld [vmem:[#allocation8 + $0x60] sm:$0xff] }
  0x3b   :  { %485 = vmatprep.mubr.msk.f32.mxu0 %vm612_vm0, %v611_v0  ;;  %424 = vmatprep.subr.mxu1 %v611_v0  ;;  %v270_v24 = vld [vmem:[#allocation8 + $0x58] sm:$0xff]  ;;  %v269_v25 = vld [vmem:[#allocation8 + $0x50] sm:$0xff]  ;;  %v268_v26 = vld [vmem:[#allocation8 + $0x48] sm:$0xff]  ;;  %p585_p10 = pnand %p584_p9, %p578_p6 }
  0x3c   :  { %425 = vmatpush3.msra.mxu1 %v177_v7  ;;  %454 = vmatpush3.msra.mxu0 %v274_v20  ;;  %v267_v27 = vld [vmem:[#allocation8 + $0x40] sm:$0xff]  ;;  %v266_v28 = vld [vmem:[#allocation8 + $0x38] sm:$0xff]  ;;  %v265_v29 = vld [vmem:[#allocation8 + $0x30] sm:$0xff] }
  0x3d   :  { %426 = vmatprep.subr.mxu1 %v611_v0  ;;  %455 = vmatprep.subr.mxu0 %v611_v0  ;;  %v264_v30 = vld [vmem:[#allocation8 + $0x28] sm:$0xff]  ;;  %v263_v31 = vld [vmem:[#allocation8 + $0x20] sm:$0xff]  ;;  %v262_v32 = vld [vmem:[#allocation8 + $0x18] sm:$0xff] }
  0x3e   :  { %427 = vmatpush3.msra.mxu1 %v176_v8  ;;  %456 = vmatpush3.msra.mxu0 %v273_v21  ;;  %v370_v33 = vld [vmem:[%s729_s2] ss:$0 sm:$0xff]  ;;  %v261_v38 = vld [vmem:[#allocation8 + $0x10] sm:$0xff]  ;;  %v259_v40 = vld [vmem:[#allocation8] sm:$0xff] }
  0x3f   :  { %428 = vmatprep.subr.mxu1 %v611_v0  ;;  %457 = vmatprep.subr.mxu0 %v611_v0  ;;  %v260_v39 = vld [vmem:[#allocation8 + $0x8] sm:$0xff] }
  0x40   :  { %429 = vmatpush3.msra.mxu1 %v175_v9  ;;  %458 = vmatpush3.msra.mxu0 %v272_v22  ;;  %v372_v41 = vld [vmem:[%s731_s4] ss:$0 sm:$0xff] }
  0x41   :  { %430 = vmatprep.subr.mxu1 %v611_v0  ;;  %459 = vmatprep.subr.mxu0 %v611_v0  ;;  %v373_v46 = vld [vmem:[%s733_s6] ss:$0 sm:$0xff] }
  0x42   :  { %431 = vmatpush3.msra.mxu1 %v174_v10  ;;  %460 = vmatpush3.msra.mxu0 %v271_v23 }
  0x43   :  { %432 = vmatprep.subr.mxu1 %v611_v0  ;;  %461 = vmatprep.subr.mxu0 %v611_v0 }
  0x44   :  { %433 = vmatpush3.msra.mxu1 %v173_v11  ;;  %462 = vmatpush3.msra.mxu0 %v270_v24 }
  0x45   :  { %434 = vmatprep.subr.mxu1 %v611_v0  ;;  %463 = vmatprep.subr.mxu0 %v611_v0 }
  0x46   :  { %435 = vmatpush3.msra.mxu1 %v172_v12  ;;  %464 = vmatpush3.msra.mxu0 %v269_v25 }
  0x47   :  { %436 = vmatprep.subr.mxu1 %v611_v0  ;;  %465 = vmatprep.subr.mxu0 %v611_v0 }
  0x48   :  { %437 = vmatpush3.msra.mxu1 %v171_v13  ;;  %466 = vmatpush3.msra.mxu0 %v268_v26 }
  0x49   :  { %438 = vmatprep.subr.mxu1 %v611_v0  ;;  %467 = vmatprep.subr.mxu0 %v611_v0 }
  0x4a   :  { %439 = vmatpush3.msra.mxu1 %v170_v14  ;;  %468 = vmatpush3.msra.mxu0 %v267_v27 }
  0x4b   :  { %440 = vmatprep.subr.mxu1 %v611_v0  ;;  %469 = vmatprep.subr.mxu0 %v611_v0 }
  0x4c   :  { %441 = vmatpush3.msra.mxu1 %v169_v15  ;;  %470 = vmatpush3.msra.mxu0 %v266_v28 }
  0x4d   :  { %442 = vmatprep.subr.mxu1 %v611_v0  ;;  %471 = vmatprep.subr.mxu0 %v611_v0 }
  0x4e   :  { %443 = vmatpush3.msra.mxu1 %v168_v16  ;;  %472 = vmatpush3.msra.mxu0 %v265_v29 }
  0x4f   :  { %444 = vmatprep.subr.mxu1 %v611_v0  ;;  %473 = vmatprep.subr.mxu0 %v611_v0 }
  0x50   :  { %445 = vmatpush3.msra.mxu1 %v167_v17  ;;  %474 = vmatpush3.msra.mxu0 %v264_v30 }
  0x51   :  { %446 = vmatprep.subr.mxu1 %v611_v0  ;;  %475 = vmatprep.subr.mxu0 %v611_v0 }
  0x52   :  { %447 = vmatpush3.msra.mxu1 %v166_v18  ;;  %476 = vmatpush3.msra.mxu0 %v263_v31 }
  0x53   :  { %448 = vmatprep.subr.mxu1 %v611_v0  ;;  %477 = vmatprep.subr.mxu0 %v611_v0 }
  0x54   :  { %449 = vmatpush3.msra.mxu1 %v165_v19  ;;  %478 = vmatpush3.msra.mxu0 %v262_v32 }
  0x55   :  { %479 = vmatprep.subr.mxu0 %v611_v0 }
  0x56   :  { %480 = vmatpush3.msra.mxu0 %v261_v38 }
  0x57   :  { %481 = vmatprep.subr.mxu0 %v611_v0 }
  0x58   :  { %482 = vmatpush3.msra.mxu0 %v260_v39 }
  0x59   :  { %483 = vmatprep.subr.mxu0 %v611_v0 }
  0x5a   :  { %484 = vmatpush3.msra.mxu0 %v259_v40 }
  0xf9   :  { %v160_v34 = vpop.f32.mrf.mxu0 }
  0xfa   :  { %v161_v35 = vadd.f32 %v370_v33, %v160_v34 }
  0xfb   :  { %v417_v36 = vpop.f32.mrf.mxu0 }
  0xfc   :  { %v164_v37 = vmax.f32 %v161_v35, 0.0 }
  0xfe   :  { %451 = vmatmul.mubr.f32.vlgmr.msra.gmra.mxu1 %v164_v37 }
 0x1be   :  { %v254_v42 = vpop.f32.mrf.mxu1 }
 0x1bf   :  { %v255_v43 = vadd.f32 %v372_v41, %v254_v42 }
 0x1c0   :  { %v452_v44 = vpop.f32.mrf.mxu1 }
 0x1c1   :  { %v258_v45 = vmax.f32 %v255_v43, 0.0 }
 0x1c3   :  { %486 = vmatmul.mubr.f32.vlgmr.msra.gmra.mxu0 %v258_v45 }
 0x283   :  { %v348_v47 = vpop.f32.mrf.mxu0 }
 0x284   :  { %v349_v48 = vadd.f32 %v373_v46, %v348_v47 }
 0x285   :  { %v487_v49 = vpop.f32.mrf.mxu0 }
 0x286   :  { %352 = vst [vmem:[#allocation10] sm:$0xf] %v349_v48 }
 0x287   :  { %588 = shalt.err (!%p585_p10)
}
 0x288   :  { %362 = dma.vmem_to_hbm [thread:$0]  %s360_s25, 64, %s734_s7, [#allocation4]  }
 0x289   :  { %603 = dma.done.wait [#allocation4], 64  }
 0x28a   :  { %604 = vsyncadd [#allocation4], 4294967232 }
 0x28b   :  { %366 = vsyncpa [#allocation3], 1 }
 0x28c   :  { %367 = vsyncpa [#allocation6], 1 }
 0x28d   :  { %368 = vsyncpa [#allocation9], 1 }
 0x28e   :  { %369 = vsyncpa [#allocation4], 1 }

// kernel: tpu_custom_call.1
= control target key start
LH: loop header
LB: loop body
LE: loop exit
PB: predicated region body
PF: predicated region fallthrough
CT: control target
= control target key end

     0   :  { %12 = vsyncpa [#allocation3], 0  ;;  %s727_s0 = inlined_call_operand.hbm [shape: f32[4,16], index: 0, kind: input, shape index: {}]   ;;  %s728_s1 = inlined_call_operand.hbm [shape: f32[16,128], index: 1, kind: input, shape index: {}]   ;;  %s729_s2 = inlined_call_operand.vmem [shape: f32[1,128], index: 2, kind: input, shape index: {}]   ;;  %s730_s3 = inlined_call_operand.hbm [shape: f32[128,128], index: 3, kind: input, shape index: {}]   ;;  %s731_s4 = inlined_call_operand.vmem [shape: f32[1,128], index: 4, kind: input, shape index: {}]   ;;  %s732_s5 = inlined_call_operand.hbm [shape: f32[128,128], index: 5, kind: input, shape index: {}]   ;;  %s733_s6 = inlined_call_operand.vmem [shape: f32[1,128], index: 6, kind: input, shape index: {}]   ;;  %s734_s7 = inlined_call_operand.hbm [shape: f32[4,128], index: 7, kind: output, shape index: {}]  }
   0x1   :  { %13 = vsyncpa [#allocation6], 0 }
   0x2   :  { %14 = vsyncpa [#allocation9], 0 }
   0x3   :  { %15 = vsyncpa [#allocation4], 0  ;;  %s605_s24 = smov [#allocation5]  }
   0x4   :  { %s31_s25 = sshll.u32 %s605_s24, 4  ;;  %s32_s25 = int_to_ptr.vmem [resolvable:$true] %s31_s25 }
   0x5   :  { %s505_s26 = scalar_lea.vmem %s32_s25, 256  ;;  %p510_p1 = scmp.lt.s32.totalorder %s32_s25, %s32_s25 }
   0x6   :  { %p506_p0 = scmp.ne.s32.totalorder %s32_s25, %s505_s26  ;;  %p511_p2 = scmp.lt.s32.totalorder %s505_s26, %s505_s26 }
   0x8   :  { %p512_p3 = por %p511_p2, %p510_p1 }
   0xa   :  { %p513_p4 = pnand %p512_p3, %p506_p0 }
   0xc   :  { %516 = shalt.err (!%p513_p4)
}
   0xd   :  { %s606_s27 = smov 128   ;;  %s607_s28 = smov 8  }
   0xe   :  { %37 = dma.hbm_to_vmem [thread:$0]  %s728_s1, 256, %s32_s25, [#allocation6], %s606_s27, %s606_s27, %s607_s28  }
   0xf   :  { %s608_s8 = smov [#allocation2]   ;;  %s609_s10 = smov [#allocation7]  }
  0x10   :  { %s22_s9 = sshll.u32 %s608_s8, 4  ;;  %s45_s11 = sshll.u32 %s609_s10, 4  ;;  %s23_s9 = int_to_ptr.vmem [resolvable:$true] %s22_s9  ;;  %s46_s11 = int_to_ptr.vmem [resolvable:$true] %s45_s11 }
  0x11   :  { %s525_s12 = scalar_lea.vmem %s23_s9, 64  ;;  %p530_p6 = scmp.lt.s32.totalorder %s23_s9, %s23_s9 }
  0x12   :  { %p526_p5 = scmp.ne.s32.totalorder %s23_s9, %s525_s12  ;;  %p531_p7 = scmp.lt.s32.totalorder %s525_s12, %s525_s12 }
  0x14   :  { %p532_p8 = por %p531_p7, %p530_p6 }
  0x16   :  { %p533_p9 = pnand %p532_p8, %p526_p5 }
  0x18   :  { %536 = shalt.err (!%p533_p9)
}
  0x19   :  { %25 = dma.hbm_to_vmem [thread:$0]  %s727_s0, 64, %s23_s9, [#allocation3]  }
  0x1a   :  { %s545_s15 = scalar_lea.vmem %s46_s11, 2048  ;;  %p550_p11 = scmp.lt.s32.totalorder %s46_s11, %s46_s11 }
  0x1b   :  { %p546_p10 = scmp.ne.s32.totalorder %s46_s11, %s545_s15  ;;  %p551_p12 = scmp.lt.s32.totalorder %s545_s15, %s545_s15 }
  0x1d   :  { %p552_p13 = por %p551_p12, %p550_p11 }
  0x1f   :  { %p553_p0 = pnand %p552_p13, %p546_p10 }
  0x21   :  { %556 = shalt.err (!%p553_p0)
}
  0x22   :  { %51 = dma.hbm_to_vmem [thread:$0]  %s730_s3, 2048, %s46_s11, [#allocation6], %s606_s27, %s606_s27, %s607_s28  }
  0x23   :  { %s610_s17 = smov [#allocation8]  }
  0x24   :  { %s59_s18 = sshll.u32 %s610_s17, 4  ;;  %s60_s18 = int_to_ptr.vmem [resolvable:$true] %s59_s18 }
  0x25   :  { %s565_s19 = scalar_lea.vmem %s60_s18, 2048  ;;  %p570_p2 = scmp.lt.s32.totalorder %s60_s18, %s60_s18 }
  0x26   :  { %p566_p1 = scmp.ne.s32.totalorder %s60_s18, %s565_s19  ;;  %p571_p3 = scmp.lt.s32.totalorder %s565_s19, %s565_s19 }
  0x28   :  { %p572_p4 = por %p571_p3, %p570_p2 }
  0x2a   :  { %p573_p5 = pnand %p572_p4, %p566_p1 }
  0x2c   :  { %576 = shalt.err (!%p573_p5)
}
  0x2d   :  { %65 = dma.hbm_to_vmem [thread:$0]  %s732_s5, 2048, %s60_s18, [#allocation9], %s606_s27, %s606_s27, %s607_s28  }
  0x2e   :  { %597 = dma.done.wait [#allocation3], 64  }
  0x2f   :  { %598 = vsyncadd [#allocation3], 4294967232 }
  0x30   :  { %599 = dma.done.wait [#allocation6], 2304  }
  0x31   :  { %600 = vsyncadd [#allocation6], 4294964992 }
  0x32   :  { %601 = dma.done.wait [#allocation9], 2048  }
  0x33   :  { %602 = vsyncadd [#allocation9], 4294965248  ;;  %v611_v0 = vmov 0.0   ;;  %vm612_vm0 = vmmov 0   ;;  %v82_v1 = vld [vmem:[#allocation5 + $0x8] sm:$0xff]  ;;  %v81_v2 = vld [vmem:[#allocation5] sm:$0xff] }
  0x34   :  { %411 = vmatprep.subr.mxu0 %v611_v0  ;;  %415 = vmatprep.mubr.msk.f32.mxu0 %vm612_vm0, %v611_v0  ;;  %v80_v3 = vld [vmem:[#allocation2] sm:$0xf]  ;;  %vm90_vm1 = vcmask 130048   ;;  %v180_v4 = vld [vmem:[#allocation7 + $0x78] sm:$0xff]  ;;  %v179_v5 = vld [vmem:[#allocation7 + $0x70] sm:$0xff]  ;;  %s613_s24 = smov [#allocation10]  }
  0x35   :  { %418 = vmatprep.subr.mxu1 %v611_v0  ;;  %450 = vmatprep.mubr.msk.f32.mxu1 %vm612_vm0, %v611_v0  ;;  %v178_v6 = vld [vmem:[#allocation7 + $0x68] sm:$0xff]  ;;  %v177_v7 = vld [vmem:[#allocation7 + $0x60] sm:$0xff]  ;;  %v176_v8 = vld [vmem:[#allocation7 + $0x58] sm:$0xff]  ;;  %s359_s25 = sshll.u32 %s613_s24, 4  ;;  %s360_s25 = int_to_ptr.vmem [resolvable:$true] %s359_s25 }
  0x36   :  { %412 = vmatpush3.msra.mxu0 %v82_v1  ;;  %419 = vmatpush3.msra.mxu1 %v180_v4  ;;  %v175_v9 = vld [vmem:[#allocation7 + $0x50] sm:$0xff]  ;;  %v174_v10 = vld [vmem:[#allocation7 + $0x48] sm:$0xff]  ;;  %v173_v11 = vld [vmem:[#allocation7 + $0x40] sm:$0xff]  ;;  %s577_s26 = scalar_lea.vmem %s360_s25, 64  ;;  %p582_p7 = scmp.lt.s32.totalorder %s360_s25, %s360_s25 }
  0x37   :  { %413 = vmatprep.subr.mxu0 %v611_v0  ;;  %420 = vmatprep.subr.mxu1 %v611_v0  ;;  %v172_v12 = vld [vmem:[#allocation7 + $0x38] sm:$0xff]  ;;  %v171_v13 = vld [vmem:[#allocation7 + $0x30] sm:$0xff]  ;;  %v170_v14 = vld [vmem:[#allocation7 + $0x28] sm:$0xff]  ;;  %p578_p6 = scmp.ne.s32.totalorder %s360_s25, %s577_s26  ;;  %p583_p8 = scmp.lt.s32.totalorder %s577_s26, %s577_s26 }
  0x38   :  { %414 = vmatpush3.msra.mxu0 %v81_v2  ;;  %421 = vmatpush3.msra.mxu1 %v179_v5  ;;  %v169_v15 = vld [vmem:[#allocation7 + $0x20] sm:$0xff]  ;;  %v168_v16 = vld [vmem:[#allocation7 + $0x18] sm:$0xff]  ;;  %v167_v17 = vld [vmem:[#allocation7 + $0x10] sm:$0xff] }
  0x39   :  { %416 = vmatmul.mubr.msk.f32.vlgmr.msra.gmra.mxu0 %vm90_vm1, %v80_v3  ;;  %422 = vmatprep.subr.mxu1 %v611_v0  ;;  %v166_v18 = vld [vmem:[#allocation7 + $0x8] sm:$0xff]  ;;  %v165_v19 = vld [vmem:[#allocation7] sm:$0xff]  ;;  %v274_v20 = vld [vmem:[#allocation8 + $0x78] sm:$0xff]  ;;  %p584_p9 = por %p583_p8, %p582_p7 }
  0x3a   :  { %453 = vmatprep.subr.mxu0 %v611_v0  ;;  %423 = vmatpush3.msra.mxu1 %v178_v6  ;;  %v273_v21 = vld [vmem:[#allocation8 + $0x70] sm:$0xff]  ;;  %v272_v22 = vld [vmem:[#allocation8 + $0x68] sm:$0xff]  ;;  %v271_v23 = vld [vmem:[#allocation8 + $0x60] sm:$0xff] }
  0x3b   :  { %485 = vmatprep.mubr.msk.f32.mxu0 %vm612_vm0, %v611_v0  ;;  %424 = vmatprep.subr.mxu1 %v611_v0  ;;  %v270_v24 = vld [vmem:[#allocation8 + $0x58] sm:$0xff]  ;;  %v269_v25 = vld [vmem:[#allocation8 + $0x50] sm:$0xff]  ;;  %v268_v26 = vld [vmem:[#allocation8 + $0x48] sm:$0xff]  ;;  %p585_p10 = pnand %p584_p9, %p578_p6 }
  0x3c   :  { %425 = vmatpush3.msra.mxu1 %v177_v7  ;;  %454 = vmatpush3.msra.mxu0 %v274_v20  ;;  %v267_v27 = vld [vmem:[#allocation8 + $0x40] sm:$0xff]  ;;  %v266_v28 = vld [vmem:[#allocation8 + $0x38] sm:$0xff]  ;;  %v265_v29 = vld [vmem:[#allocation8 + $0x30] sm:$0xff] }
  0x3d   :  { %426 = vmatprep.subr.mxu1 %v611_v0  ;;  %455 = vmatprep.subr.mxu0 %v611_v0  ;;  %v264_v30 = vld [vmem:[#allocation8 + $0x28] sm:$0xff]  ;;  %v263_v31 = vld [vmem:[#allocation8 + $0x20] sm:$0xff]  ;;  %v262_v32 = vld [vmem:[#allocation8 + $0x18] sm:$0xff] }
  0x3e   :  { %427 = vmatpush3.msra.mxu1 %v176_v8  ;;  %456 = vmatpush3.msra.mxu0 %v273_v21  ;;  %v370_v33 = vld [vmem:[%s729_s2] ss:$0 sm:$0xff]  ;;  %v261_v38 = vld [vmem:[#allocation8 + $0x10] sm:$0xff]  ;;  %v259_v40 = vld [vmem:[#allocation8] sm:$0xff] }
  0x3f   :  { %428 = vmatprep.subr.mxu1 %v611_v0  ;;  %457 = vmatprep.subr.mxu0 %v611_v0  ;;  %v260_v39 = vld [vmem:[#allocation8 + $0x8] sm:$0xff] }
  0x40   :  { %429 = vmatpush3.msra.mxu1 %v175_v9  ;;  %458 = vmatpush3.msra.mxu0 %v272_v22  ;;  %v372_v41 = vld [vmem:[%s731_s4] ss:$0 sm:$0xff] }
  0x41   :  { %430 = vmatprep.subr.mxu1 %v611_v0  ;;  %459 = vmatprep.subr.mxu0 %v611_v0  ;;  %v373_v46 = vld [vmem:[%s733_s6] ss:$0 sm:$0xff] }
  0x42   :  { %431 = vmatpush3.msra.mxu1 %v174_v10  ;;  %460 = vmatpush3.msra.mxu0 %v271_v23 }
  0x43   :  { %432 = vmatprep.subr.mxu1 %v611_v0  ;;  %461 = vmatprep.subr.mxu0 %v611_v0 }
  0x44   :  { %433 = vmatpush3.msra.mxu1 %v173_v11  ;;  %462 = vmatpush3.msra.mxu0 %v270_v24 }
  0x45   :  { %434 = vmatprep.subr.mxu1 %v611_v0  ;;  %463 = vmatprep.subr.mxu0 %v611_v0 }
  0x46   :  { %435 = vmatpush3.msra.mxu1 %v172_v12  ;;  %464 = vmatpush3.msra.mxu0 %v269_v25 }
  0x47   :  { %436 = vmatprep.subr.mxu1 %v611_v0  ;;  %465 = vmatprep.subr.mxu0 %v611_v0 }
  0x48   :  { %437 = vmatpush3.msra.mxu1 %v171_v13  ;;  %466 = vmatpush3.msra.mxu0 %v268_v26 }
  0x49   :  { %438 = vmatprep.subr.mxu1 %v611_v0  ;;  %467 = vmatprep.subr.mxu0 %v611_v0 }
  0x4a   :  { %439 = vmatpush3.msra.mxu1 %v170_v14  ;;  %468 = vmatpush3.msra.mxu0 %v267_v27 }
  0x4b   :  { %440 = vmatprep.subr.mxu1 %v611_v0  ;;  %469 = vmatprep.subr.mxu0 %v611_v0 }
  0x4c   :  { %441 = vmatpush3.msra.mxu1 %v169_v15  ;;  %470 = vmatpush3.msra.mxu0 %v266_v28 }
  0x4d   :  { %442 = vmatprep.subr.mxu1 %v611_v0  ;;  %471 = vmatprep.subr.mxu0 %v611_v0 }
  0x4e   :  { %443 = vmatpush3.msra.mxu1 %v168_v16  ;;  %472 = vmatpush3.msra.mxu0 %v265_v29 }
  0x4f   :  { %444 = vmatprep.subr.mxu1 %v611_v0  ;;  %473 = vmatprep.subr.mxu0 %v611_v0 }
  0x50   :  { %445 = vmatpush3.msra.mxu1 %v167_v17  ;;  %474 = vmatpush3.msra.mxu0 %v264_v30 }
  0x51   :  { %446 = vmatprep.subr.mxu1 %v611_v0  ;;  %475 = vmatprep.subr.mxu0 %v611_v0 }
  0x52   :  { %447 = vmatpush3.msra.mxu1 %v166_v18  ;;  %476 = vmatpush3.msra.mxu0 %v263_v31 }
  0x53   :  { %448 = vmatprep.subr.mxu1 %v611_v0  ;;  %477 = vmatprep.subr.mxu0 %v611_v0 }
  0x54   :  { %449 = vmatpush3.msra.mxu1 %v165_v19  ;;  %478 = vmatpush3.msra.mxu0 %v262_v32 }
  0x55   :  { %479 = vmatprep.subr.mxu0 %v611_v0 }
  0x56   :  { %480 = vmatpush3.msra.mxu0 %v261_v38 }
  0x57   :  { %481 = vmatprep.subr.mxu0 %v611_v0 }
  0x58   :  { %482 = vmatpush3.msra.mxu0 %v260_v39 }
  0x59   :  { %483 = vmatprep.subr.mxu0 %v611_v0 }
  0x5a   :  { %484 = vmatpush3.msra.mxu0 %v259_v40 }
  0xf9   :  { %v160_v34 = vpop.f32.mrf.mxu0 }
  0xfa   :  { %v161_v35 = vadd.f32 %v370_v33, %v160_v34 }
  0xfb   :  { %v417_v36 = vpop.f32.mrf.mxu0 }
  0xfc   :  { %v164_v37 = vmax.f32 %v161_v35, 0.0 }
  0xfe   :  { %451 = vmatmul.mubr.f32.vlgmr.msra.gmra.mxu1 %v164_v37 }
 0x1be   :  { %v254_v42 = vpop.f32.mrf.mxu1 }
 0x1bf   :  { %v255_v43 = vadd.f32 %v372_v41, %v254_v42 }
 0x1c0   :  { %v452_v44 = vpop.f32.mrf.mxu1 }
 0x1c1   :  { %v258_v45 = vmax.f32 %v255_v43, 0.0 }
 0x1c3   :  { %486 = vmatmul.mubr.f32.vlgmr.msra.gmra.mxu0 %v258_v45 }
 0x283   :  { %v348_v47 = vpop.f32.mrf.mxu0 }
 0x284   :  { %v349_v48 = vadd.f32 %v373_v46, %v348_v47 }
 0x285   :  { %v487_v49 = vpop.f32.mrf.mxu0 }
 0x286   :  { %352 = vst [vmem:[#allocation10] sm:$0xf] %v349_v48 }
 0x287   :  { %588 = shalt.err (!%p585_p10)
}
 0x288   :  { %362 = dma.vmem_to_hbm [thread:$0]  %s360_s25, 64, %s734_s7, [#allocation4]  }
 0x289   :  { %603 = dma.done.wait [#allocation4], 64  }
 0x28a   :  { %604 = vsyncadd [#allocation4], 4294967232 }
 0x28b   :  { %366 = vsyncpa [#allocation3], 1 }
 0x28c   :  { %367 = vsyncpa [#allocation6], 1 }
 0x28d   :  { %368 = vsyncpa [#allocation9], 1 }
 0x28e   :  { %369 = vsyncpa [#allocation4], 1 }

</bundles_post_ra>
